<compile_context>
chip_gen: v7x
topology: tpu7x:2x2x1
jax: 0.10.0
libtpu: 0.0.40
codegen_flags: <defaults>
</compile_context>

<pallas_src>
import functools

import jax
import jax.numpy as jnp
from jax import lax
from jax.experimental import pallas as pl
from jax.experimental.pallas import tpu as pltpu

# Per-tile byte budget for the logits block. With ~4 full-block elementwise
# temporaries in the kernel plus 2x input double-buffering, total working set
# stays well under the 16 MiB scoped-VMEM default of v5e (and far under v6e/v7x).
_LOGITS_BLOCK_BYTES = 2 * 1024 * 1024
_MAX_TILE_N = 1024


def _round_up(x, m):
    return ((x + m - 1) // m) * m


def _pick_tile_n(n, c):
    """Largest row-tile that respects the VMEM budget; never exceeds the array."""
    c_lanes = _round_up(c, 128)
    by_vmem = max(8, (_LOGITS_BLOCK_BYTES // (c_lanes * 4)) // 8 * 8)
    tn = min(_MAX_TILE_N, by_vmem)
    if n < tn:
        # single / few tiles: keep the block row-dim <= array row-dim
        tn = n if n < 8 else (n // 8) * 8
    return int(tn)


def _wce_kernel(n_rows, logits_ref, target_ref, selw_ref, partial_ref):
    """Per-tile numerator partial: sum_i w[y_i] * (logsumexp(x_i) - x_i[y_i])."""
    logits = logits_ref[...].astype(jnp.float32)   # (Tn, C) f32 (upcast if bf16)
    tgt = target_ref[...]                          # (Tn, 1)  i32
    sel_w = selw_ref[...]                          # (Tn, 1)  f32  (= w[y_i], hoisted gather)

    tn, c = logits.shape

    # numerically-stable logsumexp over the class (lane) axis
    m = jnp.max(logits, axis=-1, keepdims=True)
    lse = m + jnp.log(jnp.sum(jnp.exp(logits - m), axis=-1, keepdims=True))

    # logit at the target class via iota compare (no gather on TPU)
    class_ids = lax.broadcasted_iota(jnp.int32, (tn, c), 1)
    sel_logit = jnp.sum(jnp.where(class_ids == tgt, logits, 0.0),
                        axis=-1, keepdims=True)

    # mask rows of the ragged last tile (their block contents are undefined);
    # where() (select) keeps any garbage NaN/inf from propagating.
    row_ids = pl.program_id(0) * tn + lax.broadcasted_iota(jnp.int32, (tn, 1), 0)
    per_row = jnp.where(row_ids < n_rows, sel_w * (lse - sel_logit), 0.0)

    # lane-dense per-tile partial: scalar broadcast over one full (8,128) block
    partial_ref[...] = jnp.full((1, 8, 128), jnp.sum(per_row), dtype=jnp.float32)


@jax.jit
def weighted_cross_entropy_loss(logits, targets, weights):
    """logits: (N, C) f32/bf16, targets: (N,) int, weights: (C,) f32 -> scalar f32."""
    n, c = logits.shape
    targets = targets.astype(jnp.int32)
    weights = weights.astype(jnp.float32)

    tn = _pick_tile_n(n, c)
    num_tiles = pl.cdiv(n, tn)

    # Hoisted to XLA: N-element class-weight gather and the denominator.
    sel_w = jnp.take(weights, targets, axis=0).astype(jnp.float32)
    den = jnp.sum(sel_w)

    partials = pl.pallas_call(
        functools.partial(_wce_kernel, n),
        out_shape=jax.ShapeDtypeStruct((num_tiles, 8, 128), jnp.float32),
        grid=(num_tiles,),
        in_specs=[
            pl.BlockSpec((tn, c), lambda i: (i, 0)),   # logits tile (full class dim)
            pl.BlockSpec((tn, 1), lambda i: (i, 0)),   # targets tile
            pl.BlockSpec((tn, 1), lambda i: (i, 0)),   # w[y] tile
        ],
        out_specs=pl.BlockSpec((1, 8, 128), lambda i: (i, 0, 0)),
        compiler_params=pltpu.CompilerParams(
            dimension_semantics=("parallel",),         # independent tiles -> both TCs on v7x
        ),
    )(logits, targets.reshape(n, 1), sel_w.reshape(n, 1))

    num = jnp.sum(partials[:, 0, 0])
    return (num / den).astype(jnp.float32)


def compute_class_weights(labels, num_classes):
    """Mirror of WeightedCrossEntropyLoss.__compute_weights (dataset glue, plain JAX)."""
    counts = jnp.bincount(labels, length=num_classes)
    total = labels.shape[0]
    return (total / (counts.astype(jnp.float32) + 1e-06)).astype(jnp.float32)


if __name__ == "__main__":
    num_classes = 103

    key = jax.random.PRNGKey(0)
    k_ds, k_logit, k_tgt, k_logit2, k_tgt2 = jax.random.split(key, 5)

    # synthetic "dataset labels" used to derive the class weights deterministically
    dataset_labels = jax.random.randint(k_ds, (256,), 0, num_classes, dtype=jnp.int32)
    weights = compute_class_weights(dataset_labels, num_classes)

    def ref_loss(lg, tg, w):
        logp = jax.nn.log_softmax(lg.astype(jnp.float32), axis=-1)
        nll = -jnp.take_along_axis(logp, tg[:, None], axis=-1)[:, 0]
        w_sel = w[tg]
        return jnp.sum(w_sel * nll) / jnp.sum(w_sel)

    # primary small example (batch = 8, exact tile)
    batch = 8
    logits = jax.random.normal(k_logit, (batch, num_classes), dtype=jnp.float32)
    targets = jax.random.randint(k_tgt, (batch,), 0, num_classes, dtype=jnp.int32)
    loss = weighted_cross_entropy_loss(logits, targets, weights)
    jax.block_until_ready(loss)
    assert jnp.allclose(loss, ref_loss(logits, targets, weights),
                        rtol=1e-5, atol=1e-5), (loss, ref_loss(logits, targets, weights))

    # second check: ragged batch -> multi-tile grid + in-kernel row masking
    batch2 = 19
    logits2 = jax.random.normal(k_logit2, (batch2, num_classes), dtype=jnp.float32)
    targets2 = jax.random.randint(k_tgt2, (batch2,), 0, num_classes, dtype=jnp.int32)
    loss2 = weighted_cross_entropy_loss(logits2, targets2, weights)
    jax.block_until_ready(loss2)
    assert jnp.allclose(loss2, ref_loss(logits2, targets2, weights),
                        rtol=1e-5, atol=1e-5), (loss2, ref_loss(logits2, targets2, weights))

    print("KERNEL_OK")
</pallas_src>

<mosaic_0001>
module attributes {stable_mosaic.version = 11 : i64} {
  func.func @_wce_kernel(%arg0: i32, %arg1: memref<8x103xf32, #tpu.memory_space<vmem>>, %arg2: memref<8x1xi32, #tpu.memory_space<vmem>>, %arg3: memref<8x1xf32, #tpu.memory_space<vmem>>, %arg4: memref<1x8x128xf32, #tpu.memory_space<vmem>>) attributes {dimension_semantics = [#tpu.dimension_semantics<parallel>], iteration_bounds = array<i64: 1>, scalar_prefetch = 0 : i64, scratch_operands = 0 : i64, tpu.core_type = #tpu.core_type<tc>, window_params = [{transform_indices = @transform_0, window_bounds = array<i64: 8, 103>}, {transform_indices = @transform_1, window_bounds = array<i64: 8, 1>}, {transform_indices = @transform_2, window_bounds = array<i64: 8, 1>}, {transform_indices = @transform_3, window_bounds = array<i64: 1, 8, 128>}]} {
    %c0 = arith.constant 0 : index
    %c0_0 = arith.constant 0 : index
    %0 = vector.load %arg1[%c0, %c0_0] : memref<8x103xf32, #tpu.memory_space<vmem>>, vector<8x103xf32>
    %c0_1 = arith.constant 0 : index
    %c0_2 = arith.constant 0 : index
    %1 = vector.load %arg2[%c0_1, %c0_2] : memref<8x1xi32, #tpu.memory_space<vmem>>, vector<8x1xi32>
    %c0_3 = arith.constant 0 : index
    %c0_4 = arith.constant 0 : index
    %2 = vector.load %arg3[%c0_3, %c0_4] : memref<8x1xf32, #tpu.memory_space<vmem>>, vector<8x1xf32>
    %cst = arith.constant dense<0xFF800000> : vector<8xf32>
    %3 = vector.multi_reduction <maximumf>, %0, %cst [1] : vector<8x103xf32> to vector<8xf32>
    %4 = vector.shape_cast %3 : vector<8xf32> to vector<8x1xf32>
    %5 = vector.broadcast %4 : vector<8x1xf32> to vector<8x103xf32>
    %6 = arith.subf %0, %5 : vector<8x103xf32>
    %7 = math.exp %6 : vector<8x103xf32>
    %cst_5 = arith.constant dense<0.000000e+00> : vector<8xf32>
    %8 = vector.multi_reduction <add>, %7, %cst_5 [1] : vector<8x103xf32> to vector<8xf32>
    %9 = vector.shape_cast %8 : vector<8xf32> to vector<8x1xf32>
    %10 = math.log %9 : vector<8x1xf32>
    %11 = arith.addf %4, %10 : vector<8x1xf32>
    %12 = tpu.iota {dimensions = array<i32: 1>} : vector<8x103xi32>
    %13 = vector.broadcast %1 : vector<8x1xi32> to vector<8x103xi32>
    %14 = arith.cmpi eq, %12, %13 : vector<8x103xi32>
    %cst_6 = arith.constant 0.000000e+00 : f32
    %15 = vector.broadcast %cst_6 : f32 to vector<8x103xf32>
    %16 = arith.select %14, %0, %15 : vector<8x103xi1>, vector<8x103xf32>
    %cst_7 = arith.constant dense<0.000000e+00> : vector<8xf32>
    %17 = vector.multi_reduction <add>, %16, %cst_7 [1] : vector<8x103xf32> to vector<8xf32>
    %18 = vector.shape_cast %17 : vector<8xf32> to vector<8x1xf32>
    %c8_i32 = arith.constant 8 : i32
    %19 = arith.muli %arg0, %c8_i32 : i32
    %20 = tpu.iota {dimensions = array<i32: 0>} : vector<8x1xi32>
    %21 = vector.broadcast %19 : i32 to vector<8x1xi32>
    %22 = arith.addi %21, %20 : vector<8x1xi32>
    %c8_i32_8 = arith.constant 8 : i32
    %23 = vector.broadcast %c8_i32_8 : i32 to vector<8x1xi32>
    %24 = arith.cmpi slt, %22, %23 : vector<8x1xi32>
    %25 = arith.subf %11, %18 : vector<8x1xf32>
    %26 = arith.mulf %2, %25 : vector<8x1xf32>
    %cst_9 = arith.constant 0.000000e+00 : f32
    %27 = vector.broadcast %cst_9 : f32 to vector<8x1xf32>
    %28 = arith.select %24, %26, %27 : vector<8x1xi1>, vector<8x1xf32>
    %29 = vector.shape_cast %28 : vector<8x1xf32> to vector<1x8x1xf32>
    %cst_10 = arith.constant dense<0.000000e+00> : vector<1xf32>
    %30 = vector.multi_reduction <add>, %29, %cst_10 [1, 2] : vector<1x8x1xf32> to vector<1xf32>
    %31 = vector.shape_cast %30 : vector<1xf32> to vector<1x1x1xf32>
    %32 = vector.extract %31[0, 0, 0] : f32 from vector<1x1x1xf32>
    %33 = vector.broadcast %32 : f32 to vector<1x8x128xf32>
    %c0_11 = arith.constant 0 : index
    %c0_12 = arith.constant 0 : index
    %c0_13 = arith.constant 0 : index
    %34 = vector.load %arg4[%c0_11, %c0_12, %c0_13] : memref<1x8x128xf32, #tpu.memory_space<vmem>>, vector<1x8x128xf32>
    tpu.vector_store %arg4[%c0_11, %c0_12, %c0_13], %33 {strides = array<i32>} : memref<1x8x128xf32, #tpu.memory_space<vmem>>, vector<1x8x128xf32>,
    return
  }
  func.func @transform_0(%arg0: i32) -> (i32, i32) {
    %c0_i32 = arith.constant 0 : i32
    %c0_i32_0 = arith.constant 0 : i32
    return %arg0, %c0_i32 : i32, i32
  }
  func.func @transform_1(%arg0: i32) -> (i32, i32) {
    %c0_i32 = arith.constant 0 : i32
    %c0_i32_0 = arith.constant 0 : i32
    return %arg0, %c0_i32 : i32, i32
  }
  func.func @transform_2(%arg0: i32) -> (i32, i32) {
    %c0_i32 = arith.constant 0 : i32
    %c0_i32_0 = arith.constant 0 : i32
    return %arg0, %c0_i32 : i32, i32
  }
  func.func @transform_3(%arg0: i32) -> (i32, i32, i32) {
    %c0_i32 = arith.constant 0 : i32
    %c0_i32_0 = arith.constant 0 : i32
    %c0_i32_1 = arith.constant 0 : i32
    return %arg0, %c0_i32, %c0_i32_0 : i32, i32, i32
  }
}

</mosaic_0001>

<bundles_post_ra>
// kernel: weighted_cross_entropy_loss.1
= control target key start
LH: loop header
LB: loop body
LE: loop exit
PB: predicated region body
PF: predicated region fallthrough
CT: control target
= control target key end

     0   :  { %vm17_vm0 = vcmask 842752   ;;  %v74_v1 = vmov 0   ;;  %v30_v7 = vlaneseq  ;;  %vm49_vm2 = vcmask 7168   ;;  %s110_s0 = inlined_call_operand.vmem [shape: f32[8,103], index: 0, kind: input, shape index: {}]   ;;  %s111_s1 = inlined_call_operand.vmem [shape: s32[8,1], index: 1, kind: input, shape index: {}]   ;;  %s112_s2 = inlined_call_operand.vmem [shape: f32[8,1], index: 2, kind: input, shape index: {}]   ;;  %s113_s3 = inlined_call_operand.vmem [shape: f32[1,8,128], index: 3, kind: output, shape index: {}]  }
   0x1   :  { %v14_v0 = vld [vmem:[%s110_s0] sm:$0xff]  ;;  %69 = vset.pattern.permute.xlu0 %v74_v1 }
   0x2   :  { %v18_v2 = vsel %vm17_vm0, %v14_v0, -inf  ;;  %v15_v3 = vld [vmem:[%s111_s1] sm:$0xff]  ;;  %v31_v8 = vand.u32 127, %v30_v7 }
   0x3   :  { %19 = vmax.xlane.f32.xlu0 %v18_v2  ;;  %v16_v19 = vld [vmem:[%s112_s2] sm:$0xff] }
  0x19   :  { %33 = vperm.xlu0 %69, %v15_v3  }
  0x90   :  { %v20_v4 = vpop.xlane.xlu0 %19 }
  0x91   :  { %v21_v5 = vsub.f32 %v14_v0, %v20_v4 }
  0x93   :  { %v22_v6 = vmul.f32 1.442695, %v21_v5 }
  0x95   :  { %70 = vpow2.f32 %v22_v6 }
  0x98   :  { %v34_v9 = vpop.permute.xlu0 %33 }
  0x99   :  { %vm35_vm1 = vcmp.eq.s32.totalorder %v31_v8, %v34_v9 }
  0x9a   :  { %v36_v11 = vsel %vm35_vm1, %v14_v0, 0.0 }
  0x9b   :  { %v37_v13 = vsel %vm17_vm0, %v36_v11, 0.0 }
  0x9f   :  { %v71_v10 = vpop.eup %70 }
  0xa0   :  { %v24_v12 = vsel %vm17_vm0, %v71_v10, 0.0 }
  0xa1   :  { %25 = vadd.xlane.f32.xlu1 %v24_v12 }
  0xa5   :  { %38 = vadd.xlane.f32.xlu1 %v37_v13 }
 0x12e   :  { %v26_v14 = vpop.xlane.xlu1 %25 }
 0x12f   :  { %72 = vlog2.f32 %v26_v14 }
 0x132   :  { %v39_v17 = vpop.xlane.xlu1 %38 }
 0x139   :  { %v73_v15 = vpop.eup %72 }
 0x13a   :  { %v28_v16 = vmul.f32 0.6931472, %v73_v15 }
 0x13c   :  { %v29_v18 = vadd.f32 %v28_v16, %v20_v4 }
 0x13e   :  { %v46_v20 = vsub.f32 %v29_v18, %v39_v17 }
 0x140   :  { %v47_v21 = vmul.f32 %v46_v20, %v16_v19 }
 0x142   :  { %v50_v22 = vsel %vm49_vm2, %v47_v21, 0.0 }
 0x143   :  { %51 = vadd.xlane.f32.xlu1 %v50_v22 }
 0x1d0   :  { %v52_v23 = vpop.xlane.xlu1 %51 }
 0x1d1   :  { %v53_v24 = vrot.slane %v52_v23, 4 }
 0x1d3   :  { %v54_v25 = vadd.f32 %v53_v24, %v52_v23 }
 0x1d5   :  { %v55_v26 = vrot.slane %v54_v25, 2 }
 0x1d7   :  { %v56_v27 = vadd.f32 %v55_v26, %v54_v25 }
 0x1d9   :  { %v57_v28 = vrot.slane %v56_v27, 1 }
 0x1db   :  { %v58_v29 = vadd.f32 %v57_v28, %v56_v27 }
 0x1dd   :  { %66 = vpush %v58_v29 }
 0x20e   :  { %s67_s16 = spop %66 }
 0x20f   :  { %v60_v30 = vstv %s67_s16 }
 0x210   :  { %61 = vst [vmem:[%s113_s3] sm:$0xff] %v60_v30 }

</bundles_post_ra>
